<compile_context>
chip_gen: v6e
topology: v6e:2x2x1
jax: 0.10.0
libtpu: 0.0.40
codegen_flags: <defaults>
</compile_context>

<pallas_src>
import jax
import jax.numpy as jnp
from jax import lax
from jax.experimental import pallas as pl
from jax.experimental.pallas import tpu as pltpu

LBD = 4
HBD = 16
QUANT_STEP = (2.0 ** (HBD - LBD)) / (2.0 ** HBD - 1.0)   # 4096 / 65535


def _sublane_tile(dtype):
    """Native sublane tiling for the dtype: (8,128) f32, (16,128) bf16, (32,128) int8."""
    return {4: 8, 2: 16, 1: 32}.get(jnp.dtype(dtype).itemsize, 8)


def _vmem_capacity_bytes():
    """Physical VMEM of this generation; conservative 64 MiB (v7x) fallback."""
    try:
        return int(pltpu.get_tpu_info().vmem_capacity_bytes)
    except Exception:
        return 64 * 1024 * 1024


def fused_concat_mask_kernel(w01_ref, f1_ref, w21_ref, up_ref, dn_ref, o_ref):
    """(1,1,C,TH,W) frame tiles + (1,1,C,SUB,W) halos -> (1, 3C+1, TH, W) output tile."""
    C, TH, W = f1_ref.shape[2], f1_ref.shape[3], f1_ref.shape[4]
    SUB = up_ref.shape[3]
    h = pl.program_id(1)
    nh = pl.num_programs(1)
    inv_c = 1.0 / C

    # Channel mean of the middle frame tile (C small & static -> unrolled adds).
    m = f1_ref[0, 0, 0, :, :].astype(jnp.float32)
    up_row = up_ref[0, 0, 0, SUB - 1:SUB, :].astype(jnp.float32)   # row above the tile
    dn_row = dn_ref[0, 0, 0, 0:1, :].astype(jnp.float32)           # row below the tile
    for c in range(1, C):
        m = m + f1_ref[0, 0, c, :, :].astype(jnp.float32)
        up_row = up_row + up_ref[0, 0, c, SUB - 1:SUB, :].astype(jnp.float32)
        dn_row = dn_row + dn_ref[0, 0, c, 0:1, :].astype(jnp.float32)
    m = m * inv_c            # (TH, W)
    up_row = up_row * inv_c  # (1, W)
    dn_row = dn_row * inv_c  # (1, W)

    # Zero the halo rows at the global image border (== F.conv2d zero padding).
    up_row = up_row * (h > 0).astype(jnp.float32)
    dn_row = dn_row * (h < nh - 1).astype(jnp.float32)

    row = lax.broadcasted_iota(jnp.int32, (TH, W), 0)
    col = lax.broadcasted_iota(jnp.int32, (TH, W), 1)

    # 1-pixel neighbor shifts: XLU rotates + boundary fixups (kernel is DMA-bound,
    # so positive rotate-by-N-1 is plenty; no MXU, VPU/XLU have large slack).
    up_nb = jnp.where(row == 0, jnp.broadcast_to(up_row, (TH, W)),
                      pltpu.roll(m, shift=1, axis=0))        # m[i-1, j]
    dn_nb = jnp.where(row == TH - 1, jnp.broadcast_to(dn_row, (TH, W)),
                      pltpu.roll(m, shift=TH - 1, axis=0))    # m[i+1, j]
    lf_nb = jnp.where(col == 0, 0.0,
                      pltpu.roll(m, shift=1, axis=1))         # m[i, j-1]
    rt_nb = jnp.where(col == W - 1, 0.0,
                      pltpu.roll(m, shift=W - 1, axis=1))     # m[i, j+1]

    # Fused accumulation of the four directional masks; matches the reference
    # formulation (|d| - q) < 1e-4 exactly.
    mask = ((jnp.abs(m - up_nb) - QUANT_STEP) < 1e-4).astype(jnp.float32)
    mask = mask + ((jnp.abs(m - dn_nb) - QUANT_STEP) < 1e-4).astype(jnp.float32)
    mask = mask + ((jnp.abs(m - lf_nb) - QUANT_STEP) < 1e-4).astype(jnp.float32)
    mask = mask + ((jnp.abs(m - rt_nb) - QUANT_STEP) < 1e-4).astype(jnp.float32)

    # Write the concatenated recons-net input tile directly (no wrapper concat).
    o_ref[0, 0:C, :, :] = w01_ref[0, 0]
    o_ref[0, C:2 * C, :, :] = f1_ref[0, 0]
    o_ref[0, 2 * C:3 * C, :, :] = w21_ref[0, 0]
    o_ref[0, 3 * C, :, :] = mask.astype(o_ref.dtype)


def _pick_tile_h(B, C, H, W, dtype):
    """Largest TH (multiple of the sublane tile, divides H) fitting the VMEM budget."""
    itemsize = jnp.dtype(dtype).itemsize
    sub = _sublane_tile(dtype)
    assert H % sub == 0, f"H must be a multiple of {sub}, got {H}"
    out_c = 3 * C + 1

    capacity = _vmem_capacity_bytes()
    budget = (capacity * 3) // 8        # ~48 MiB on 128-MiB v5e/v6e, ~24 MiB on 64-MiB v7x
    vmem_limit = (capacity * 11) // 16  # ~88 MiB on v5e/v6e, ~44 MiB on v7x

    # Honest per-step working-set model:
    #   per row:   3 double-buffered input frame slabs + 1 double-buffered output slab
    #              + f32 temporaries (mean, 4 neighbors, mask, iotas)
    #   per step:  2 double-buffered halo strips + compiler internal scratch
    per_row = 2 * 3 * C * W * itemsize + 2 * out_c * W * itemsize + 10 * W * 4
    fixed = 2 * 2 * C * sub * W * itemsize + (1 << 20)

    cap = max(sub, min(H, (budget - fixed) // per_row))
    th = sub
    for cand in range(sub, min(int(cap), H) + 1, sub):
        if H % cand == 0:
            th = cand

    # Ensure at least two total grid steps (pipeline depth / both v7x TensorCores),
    # but only shrink TH when the batch axis does not already provide them.
    if B * (H // th) < 2 and H >= 2 * sub:
        best = sub
        for cand in range(sub, H // 2 + 1, sub):
            if H % cand == 0:
                best = cand
        th = best
    return th, int(vmem_limit)


def fused_concat_and_mask(x):
    """x: (B, 3, C, H, W) -> (B, 3C+1, H, W) = [x[:,0], x[:,1], x[:,2], mask(x[:,1])].

    All three frames are streamed straight out of x via seq-pinned BlockSpecs
    (no wrapper-side slice materialization).
    TODO(synk): once a real Flow_PWC warp exists, warped01/warped21 become
    separate arrays and get their own in_specs instead of seq indices 0/2.
    """
    B, S, C, H, W = x.shape
    assert S == 3, "Only n_sequence=3 is supported"
    dtype = x.dtype
    itemsize = jnp.dtype(dtype).itemsize
    sub = _sublane_tile(dtype)

    # Pad spatial dims so rows match the sublane tile and output stores stay
    # lane-dense.  Zero padding reproduces F.conv2d's zero border for the mask;
    # padded rows/cols are sliced off below.
    pad_h = (-H) % sub
    pad_w = (-W) % 128
    if pad_h or pad_w:
        x = jnp.pad(x, ((0, 0), (0, 0), (0, 0), (0, pad_h), (0, pad_w)))
    Hp, Wp = H + pad_h, W + pad_w

    TH, vmem_limit = _pick_tile_h(B, C, Hp, Wp, dtype)
    nh = Hp // TH
    R = TH // sub
    hb = Hp // sub
    out_c = 3 * C + 1

    def frame_spec(seq):
        return pl.BlockSpec((1, 1, C, TH, Wp), lambda b, h, s=seq: (b, s, 0, h, 0))

    # Halo strips of the middle frame: the sublane-tile of rows just above /
    # below this tile (clamped in-bounds; the kernel zeroes them at the border).
    up_spec = pl.BlockSpec((1, 1, C, sub, Wp),
                           lambda b, h: (b, 1, 0, jnp.maximum(h * R - 1, 0), 0))
    dn_spec = pl.BlockSpec((1, 1, C, sub, Wp),
                           lambda b, h: (b, 1, 0, jnp.minimum((h + 1) * R, hb - 1), 0))

    flops = int(B * Hp * Wp * (C + 20))
    bytes_accessed = int(B * Hp * Wp * 3 * C * itemsize          # three frames in
                         + B * nh * 2 * C * sub * Wp * itemsize  # halo strips
                         + B * Hp * Wp * out_c * itemsize)       # fused output

    out = pl.pallas_call(
        fused_concat_mask_kernel,
        out_shape=jax.ShapeDtypeStruct((B, out_c, Hp, Wp), dtype),
        grid_spec=pltpu.PrefetchScalarGridSpec(
            num_scalar_prefetch=0,
            grid=(B, nh),
            in_specs=[frame_spec(0), frame_spec(1), frame_spec(2), up_spec, dn_spec],
            out_specs=pl.BlockSpec((1, out_c, TH, Wp), lambda b, h: (b, 0, h, 0)),
        ),
        compiler_params=pltpu.CompilerParams(
            dimension_semantics=("parallel", "parallel"),
            vmem_limit_bytes=vmem_limit,
        ),
        cost_estimate=pl.CostEstimate(flops=flops, transcendentals=0,
                                      bytes_accessed=bytes_accessed),
    )(x, x, x, x, x)

    if pad_h or pad_w:
        out = out[:, :, :H, :W]
    return out


def vbde_stepmask_forward(x):
    """x: (B, 3, C, H, W) -> concatenated recons-net input (B, 3*C + 1, H, W)."""
    assert x.shape[1] == 3, "Only n_sequence=3 is supported"
    # TODO(synk): flow_pwc.Flow_PWC is unavailable -> identity warp stand-in
    #             (warped01 = frame0, warped21 = frame2), so the fused kernel
    #             reads all three frames straight out of x (seq 0 / 1 / 2).
    concated = fused_concat_and_mask(x)
    # TODO(synk): RECONS_VIDEO reconstruction network unavailable; return its input.
    return concated


def _ref_quant_mask(mid_frame):
    """Pure-JAX reference of the PyTorch get_masks() for correctness checking."""
    B, C, H, W = mid_frame.shape
    m = jnp.sum(mid_frame.astype(jnp.float32), axis=1, keepdims=True) * (1.0 / C)
    mp = jnp.pad(m, ((0, 0), (0, 0), (1, 1), (1, 1)))
    c = mp[:, :, 1:-1, 1:-1]
    up = mp[:, :, 0:-2, 1:-1]
    dn = mp[:, :, 2:, 1:-1]
    lf = mp[:, :, 1:-1, 0:-2]
    rt = mp[:, :, 1:-1, 2:]
    return sum(((jnp.abs(c - n) - QUANT_STEP) < 1e-4).astype(jnp.float32)
               for n in (up, dn, lf, rt))


def _check(x):
    B, S, C, H, W = x.shape
    out = jax.block_until_ready(vbde_stepmask_forward(x))
    assert out.shape == (B, 3 * C + 1, H, W), out.shape
    # pass-through frame channels must be exact copies
    frames_ref = jnp.concatenate([x[:, 0], x[:, 1], x[:, 2]], axis=1)
    assert bool(jnp.array_equal(out[:, :3 * C], frames_ref))
    # quantization-step mask must match the pure-JAX reference of get_masks()
    mask_ref = _ref_quant_mask(x[:, 1])
    err = float(jnp.max(jnp.abs(out[:, 3 * C:] - mask_ref)))
    assert err <= 1e-5, err


if __name__ == "__main__":
    key = jax.random.PRNGKey(0)

    # Case 1: B=2 -> the batch axis already gives >= 2 grid steps, so TH == H
    # (no halving) and the whole height is one lane-dense slab per frame.
    # small-magnitude values so both mask outcomes (< / >= threshold) occur
    x1 = jax.random.uniform(key, (2, 3, 3, 16, 128), dtype=jnp.float32) * 0.3
    _check(x1)

    # Case 2: B=1, H=32, W=192 -> TH shrinks to 16 only to keep >= 2 grid steps,
    # exercising the row-halo tile boundary and the lane-padding path (W -> 256).
    x2 = jax.random.uniform(jax.random.PRNGKey(0), (1, 3, 3, 32, 192),
                            dtype=jnp.float32) * 0.3
    _check(x2)

    print("KERNEL_OK")
</pallas_src>

<mosaic_0001>
module attributes {stable_mosaic.version = 11 : i64} {
  func.func @fused_concat_mask_kernel(%arg0: i32, %arg1: i32, %arg2: memref<1x1x3x16x128xf32, #tpu.memory_space<vmem>>, %arg3: memref<1x1x3x16x128xf32, #tpu.memory_space<vmem>>, %arg4: memref<1x1x3x16x128xf32, #tpu.memory_space<vmem>>, %arg5: memref<1x1x3x8x128xf32, #tpu.memory_space<vmem>>, %arg6: memref<1x1x3x8x128xf32, #tpu.memory_space<vmem>>, %arg7: memref<1x10x16x128xf32, #tpu.memory_space<vmem>>) attributes {dimension_semantics = [#tpu.dimension_semantics<parallel>, #tpu.dimension_semantics<parallel>], iteration_bounds = array<i64: 2, 1>, scalar_prefetch = 0 : i64, scratch_operands = 0 : i64, tpu.core_type = #tpu.core_type<tc>, window_params = [{transform_indices = @transform_0, window_bounds = array<i64: 1, 1, 3, 16, 128>}, {transform_indices = @transform_1, window_bounds = array<i64: 1, 1, 3, 16, 128>}, {transform_indices = @transform_2, window_bounds = array<i64: 1, 1, 3, 16, 128>}, {transform_indices = @transform_3, window_bounds = array<i64: 1, 1, 3, 8, 128>}, {transform_indices = @transform_4, window_bounds = array<i64: 1, 1, 3, 8, 128>}, {transform_indices = @transform_5, window_bounds = array<i64: 1, 10, 16, 128>}]} {
    %c0 = arith.constant 0 : index
    %c0_0 = arith.constant 0 : index
    %c0_1 = arith.constant 0 : index
    %c0_2 = arith.constant 0 : index
    %c0_3 = arith.constant 0 : index
    %0 = vector.load %arg3[%c0, %c0_0, %c0_1, %c0_2, %c0_3] : memref<1x1x3x16x128xf32, #tpu.memory_space<vmem>>, vector<1x1x1x16x128xf32>
    %1 = vector.shape_cast %0 : vector<1x1x1x16x128xf32> to vector<16x128xf32>
    %c0_4 = arith.constant 0 : index
    %c0_5 = arith.constant 0 : index
    %c0_6 = arith.constant 0 : index
    %c7 = arith.constant 7 : index
    %c0_7 = arith.constant 0 : index
    %2 = vector.load %arg5[%c0_4, %c0_5, %c0_6, %c7, %c0_7] : memref<1x1x3x8x128xf32, #tpu.memory_space<vmem>>, vector<1x1x1x1x128xf32>
    %3 = vector.shape_cast %2 : vector<1x1x1x1x128xf32> to vector<1x128xf32>
    %c0_8 = arith.constant 0 : index
    %c0_9 = arith.constant 0 : index
    %c0_10 = arith.constant 0 : index
    %c0_11 = arith.constant 0 : index
    %c0_12 = arith.constant 0 : index
    %4 = vector.load %arg6[%c0_8, %c0_9, %c0_10, %c0_11, %c0_12] : memref<1x1x3x8x128xf32, #tpu.memory_space<vmem>>, vector<1x1x1x1x128xf32>
    %5 = vector.shape_cast %4 : vector<1x1x1x1x128xf32> to vector<1x128xf32>
    %c0_13 = arith.constant 0 : index
    %c0_14 = arith.constant 0 : index
    %c1 = arith.constant 1 : index
    %c0_15 = arith.constant 0 : index
    %c0_16 = arith.constant 0 : index
    %6 = vector.load %arg3[%c0_13, %c0_14, %c1, %c0_15, %c0_16] : memref<1x1x3x16x128xf32, #tpu.memory_space<vmem>>, vector<1x1x1x16x128xf32>
    %7 = vector.shape_cast %6 : vector<1x1x1x16x128xf32> to vector<16x128xf32>
    %8 = arith.addf %1, %7 : vector<16x128xf32>
    %c0_17 = arith.constant 0 : index
    %c0_18 = arith.constant 0 : index
    %c1_19 = arith.constant 1 : index
    %c7_20 = arith.constant 7 : index
    %c0_21 = arith.constant 0 : index
    %9 = vector.load %arg5[%c0_17, %c0_18, %c1_19, %c7_20, %c0_21] : memref<1x1x3x8x128xf32, #tpu.memory_space<vmem>>, vector<1x1x1x1x128xf32>
    %10 = vector.shape_cast %9 : vector<1x1x1x1x128xf32> to vector<1x128xf32>
    %11 = arith.addf %3, %10 : vector<1x128xf32>
    %c0_22 = arith.constant 0 : index
    %c0_23 = arith.constant 0 : index
    %c1_24 = arith.constant 1 : index
    %c0_25 = arith.constant 0 : index
    %c0_26 = arith.constant 0 : index
    %12 = vector.load %arg6[%c0_22, %c0_23, %c1_24, %c0_25, %c0_26] : memref<1x1x3x8x128xf32, #tpu.memory_space<vmem>>, vector<1x1x1x1x128xf32>
    %13 = vector.shape_cast %12 : vector<1x1x1x1x128xf32> to vector<1x128xf32>
    %14 = arith.addf %5, %13 : vector<1x128xf32>
    %c0_27 = arith.constant 0 : index
    %c0_28 = arith.constant 0 : index
    %c2 = arith.constant 2 : index
    %c0_29 = arith.constant 0 : index
    %c0_30 = arith.constant 0 : index
    %15 = vector.load %arg3[%c0_27, %c0_28, %c2, %c0_29, %c0_30] : memref<1x1x3x16x128xf32, #tpu.memory_space<vmem>>, vector<1x1x1x16x128xf32>
    %16 = vector.shape_cast %15 : vector<1x1x1x16x128xf32> to vector<16x128xf32>
    %17 = arith.addf %8, %16 : vector<16x128xf32>
    %c0_31 = arith.constant 0 : index
    %c0_32 = arith.constant 0 : index
    %c2_33 = arith.constant 2 : index
    %c7_34 = arith.constant 7 : index
    %c0_35 = arith.constant 0 : index
    %18 = vector.load %arg5[%c0_31, %c0_32, %c2_33, %c7_34, %c0_35] : memref<1x1x3x8x128xf32, #tpu.memory_space<vmem>>, vector<1x1x1x1x128xf32>
    %19 = vector.shape_cast %18 : vector<1x1x1x1x128xf32> to vector<1x128xf32>
    %20 = arith.addf %11, %19 : vector<1x128xf32>
    %c0_36 = arith.constant 0 : index
    %c0_37 = arith.constant 0 : index
    %c2_38 = arith.constant 2 : index
    %c0_39 = arith.constant 0 : index
    %c0_40 = arith.constant 0 : index
    %21 = vector.load %arg6[%c0_36, %c0_37, %c2_38, %c0_39, %c0_40] : memref<1x1x3x8x128xf32, #tpu.memory_space<vmem>>, vector<1x1x1x1x128xf32>
    %22 = vector.shape_cast %21 : vector<1x1x1x1x128xf32> to vector<1x128xf32>
    %23 = arith.addf %14, %22 : vector<1x128xf32>
    %cst = arith.constant 0.333333343 : f32
    %24 = vector.broadcast %cst : f32 to vector<16x128xf32>
    %25 = arith.mulf %17, %24 : vector<16x128xf32>
    %cst_41 = arith.constant 0.333333343 : f32
    %26 = vector.broadcast %cst_41 : f32 to vector<1x128xf32>
    %27 = arith.mulf %20, %26 : vector<1x128xf32>
    %cst_42 = arith.constant 0.333333343 : f32
    %28 = vector.broadcast %cst_42 : f32 to vector<1x128xf32>
    %29 = arith.mulf %23, %28 : vector<1x128xf32>
    %c0_i32 = arith.constant 0 : i32
    %30 = arith.cmpi sgt, %arg1, %c0_i32 : i32
    %31 = arith.extui %30 : i1 to i32
    %32 = arith.sitofp %31 : i32 to f32
    %33 = vector.broadcast %32 : f32 to vector<1x128xf32>
    %34 = arith.mulf %27, %33 : vector<1x128xf32>
    %c0_i32_43 = arith.constant 0 : i32
    %35 = arith.cmpi slt, %arg1, %c0_i32_43 : i32
    %36 = arith.extui %35 : i1 to i32
    %37 = arith.sitofp %36 : i32 to f32
    %38 = vector.broadcast %37 : f32 to vector<1x128xf32>
    %39 = arith.mulf %29, %38 : vector<1x128xf32>
    %40 = tpu.iota {dimensions = array<i32: 0>} : vector<16x128xi32>
    %41 = tpu.iota {dimensions = array<i32: 1>} : vector<16x128xi32>
    %c0_i32_44 = arith.constant 0 : i32
    %42 = vector.broadcast %c0_i32_44 : i32 to vector<16x128xi32>
    %43 = arith.cmpi eq, %40, %42 : vector<16x128xi32>
    %44 = vector.shape_cast %34 : vector<1x128xf32> to vector<1x128xf32>
    %45 = vector.broadcast %44 : vector<1x128xf32> to vector<16x128xf32>
    %c1_i32 = arith.constant 1 : i32
    %46 = tpu.dynamic_rotate %25 by %c1_i32 dim 0 : vector<16x128xf32>, i32 -> vector<16x128xf32>
    %47 = arith.select %43, %45, %46 : vector<16x128xi1>, vector<16x128xf32>
    %c15_i32 = arith.constant 15 : i32
    %48 = vector.broadcast %c15_i32 : i32 to vector<16x128xi32>
    %49 = arith.cmpi eq, %40, %48 : vector<16x128xi32>
    %50 = vector.shape_cast %39 : vector<1x128xf32> to vector<1x128xf32>
    %51 = vector.broadcast %50 : vector<1x128xf32> to vector<16x128xf32>
    %c15_i32_45 = arith.constant 15 : i32
    %52 = tpu.dynamic_rotate %25 by %c15_i32_45 dim 0 : vector<16x128xf32>, i32 -> vector<16x128xf32>
    %53 = arith.select %49, %51, %52 : vector<16x128xi1>, vector<16x128xf32>
    %c0_i32_46 = arith.constant 0 : i32
    %54 = vector.broadcast %c0_i32_46 : i32 to vector<16x128xi32>
    %55 = arith.cmpi eq, %41, %54 : vector<16x128xi32>
    %c1_i32_47 = arith.constant 1 : i32
    %56 = tpu.dynamic_rotate %25 by %c1_i32_47 dim 1 : vector<16x128xf32>, i32 -> vector<16x128xf32>
    %cst_48 = arith.constant 0.000000e+00 : f32
    %57 = vector.broadcast %cst_48 : f32 to vector<16x128xf32>
    %58 = arith.select %55, %57, %56 : vector<16x128xi1>, vector<16x128xf32>
    %c127_i32 = arith.constant 127 : i32
    %59 = vector.broadcast %c127_i32 : i32 to vector<16x128xi32>
    %60 = arith.cmpi eq, %41, %59 : vector<16x128xi32>
    %c127_i32_49 = arith.constant 127 : i32
    %61 = tpu.dynamic_rotate %25 by %c127_i32_49 dim 1 : vector<16x128xf32>, i32 -> vector<16x128xf32>
    %cst_50 = arith.constant 0.000000e+00 : f32
    %62 = vector.broadcast %cst_50 : f32 to vector<16x128xf32>
    %63 = arith.select %60, %62, %61 : vector<16x128xi1>, vector<16x128xf32>
    %64 = arith.subf %25, %47 : vector<16x128xf32>
    %65 = math.absf %64 : vector<16x128xf32>
    %cst_51 = arith.constant 0.0625009537 : f32
    %66 = vector.broadcast %cst_51 : f32 to vector<16x128xf32>
    %67 = arith.subf %65, %66 : vector<16x128xf32>
    %cst_52 = arith.constant 9.99999974E-5 : f32
    %68 = vector.broadcast %cst_52 : f32 to vector<16x128xf32>
    %69 = arith.cmpf olt, %67, %68 : vector<16x128xf32>
    %70 = arith.extui %69 : vector<16x128xi1> to vector<16x128xi32>
    %71 = arith.sitofp %70 : vector<16x128xi32> to vector<16x128xf32>
    %72 = arith.subf %25, %53 : vector<16x128xf32>
    %73 = math.absf %72 : vector<16x128xf32>
    %cst_53 = arith.constant 0.0625009537 : f32
    %74 = vector.broadcast %cst_53 : f32 to vector<16x128xf32>
    %75 = arith.subf %73, %74 : vector<16x128xf32>
    %cst_54 = arith.constant 9.99999974E-5 : f32
    %76 = vector.broadcast %cst_54 : f32 to vector<16x128xf32>
    %77 = arith.cmpf olt, %75, %76 : vector<16x128xf32>
    %78 = arith.extui %77 : vector<16x128xi1> to vector<16x128xi32>
    %79 = arith.sitofp %78 : vector<16x128xi32> to vector<16x128xf32>
    %80 = arith.addf %71, %79 : vector<16x128xf32>
    %81 = arith.subf %25, %58 : vector<16x128xf32>
    %82 = math.absf %81 : vector<16x128xf32>
    %cst_55 = arith.constant 0.0625009537 : f32
    %83 = vector.broadcast %cst_55 : f32 to vector<16x128xf32>
    %84 = arith.subf %82, %83 : vector<16x128xf32>
    %cst_56 = arith.constant 9.99999974E-5 : f32
    %85 = vector.broadcast %cst_56 : f32 to vector<16x128xf32>
    %86 = arith.cmpf olt, %84, %85 : vector<16x128xf32>
    %87 = arith.extui %86 : vector<16x128xi1> to vector<16x128xi32>
    %88 = arith.sitofp %87 : vector<16x128xi32> to vector<16x128xf32>
    %89 = arith.addf %80, %88 : vector<16x128xf32>
    %90 = arith.subf %25, %63 : vector<16x128xf32>
    %91 = math.absf %90 : vector<16x128xf32>
    %cst_57 = arith.constant 0.0625009537 : f32
    %92 = vector.broadcast %cst_57 : f32 to vector<16x128xf32>
    %93 = arith.subf %91, %92 : vector<16x128xf32>
    %cst_58 = arith.constant 9.99999974E-5 : f32
    %94 = vector.broadcast %cst_58 : f32 to vector<16x128xf32>
    %95 = arith.cmpf olt, %93, %94 : vector<16x128xf32>
    %96 = arith.extui %95 : vector<16x128xi1> to vector<16x128xi32>
    %97 = arith.sitofp %96 : vector<16x128xi32> to vector<16x128xf32>
    %98 = arith.addf %89, %97 : vector<16x128xf32>
    %c0_59 = arith.constant 0 : index
    %c0_60 = arith.constant 0 : index
    %c0_61 = arith.constant 0 : index
    %c0_62 = arith.constant 0 : index
    %c0_63 = arith.constant 0 : index
    %99 = vector.load %arg2[%c0_59, %c0_60, %c0_61, %c0_62, %c0_63] : memref<1x1x3x16x128xf32, #tpu.memory_space<vmem>>, vector<1x1x3x16x128xf32>
    %100 = vector.shape_cast %99 : vector<1x1x3x16x128xf32> to vector<3x16x128xf32>
    %c0_64 = arith.constant 0 : index
    %c0_65 = arith.constant 0 : index
    %c0_66 = arith.constant 0 : index
    %c0_67 = arith.constant 0 : index
    %101 = vector.load %arg7[%c0_64, %c0_65, %c0_66, %c0_67] : memref<1x10x16x128xf32, #tpu.memory_space<vmem>>, vector<1x3x16x128xf32>
    %102 = vector.shape_cast %101 : vector<1x3x16x128xf32> to vector<3x16x128xf32>
    %103 = vector.shape_cast %100 : vector<3x16x128xf32> to vector<1x3x16x128xf32>
    tpu.vector_store %arg7[%c0_64, %c0_65, %c0_66, %c0_67], %103 {strides = array<i32>} : memref<1x10x16x128xf32, #tpu.memory_space<vmem>>, vector<1x3x16x128xf32>,
    %c0_68 = arith.constant 0 : index
    %c0_69 = arith.constant 0 : index
    %c0_70 = arith.constant 0 : index
    %c0_71 = arith.constant 0 : index
    %c0_72 = arith.constant 0 : index
    %104 = vector.load %arg3[%c0_68, %c0_69, %c0_70, %c0_71, %c0_72] : memref<1x1x3x16x128xf32, #tpu.memory_space<vmem>>, vector<1x1x3x16x128xf32>
    %105 = vector.shape_cast %104 : vector<1x1x3x16x128xf32> to vector<3x16x128xf32>
    %c0_73 = arith.constant 0 : index
    %c3 = arith.constant 3 : index
    %c0_74 = arith.constant 0 : index
    %c0_75 = arith.constant 0 : index
    %106 = vector.load %arg7[%c0_73, %c3, %c0_74, %c0_75] : memref<1x10x16x128xf32, #tpu.memory_space<vmem>>, vector<1x3x16x128xf32>
    %107 = vector.shape_cast %106 : vector<1x3x16x128xf32> to vector<3x16x128xf32>
    %108 = vector.shape_cast %105 : vector<3x16x128xf32> to vector<1x3x16x128xf32>
    tpu.vector_store %arg7[%c0_73, %c3, %c0_74, %c0_75], %108 {strides = array<i32>} : memref<1x10x16x128xf32, #tpu.memory_space<vmem>>, vector<1x3x16x128xf32>,
    %c0_76 = arith.constant 0 : index
    %c0_77 = arith.constant 0 : index
    %c0_78 = arith.constant 0 : index
    %c0_79 = arith.constant 0 : index
    %c0_80 = arith.constant 0 : index
    %109 = vector.load %arg4[%c0_76, %c0_77, %c0_78, %c0_79, %c0_80] : memref<1x1x3x16x128xf32, #tpu.memory_space<vmem>>, vector<1x1x3x16x128xf32>
    %110 = vector.shape_cast %109 : vector<1x1x3x16x128xf32> to vector<3x16x128xf32>
    %c0_81 = arith.constant 0 : index
    %c6 = arith.constant 6 : index
    %c0_82 = arith.constant 0 : index
    %c0_83 = arith.constant 0 : index
    %111 = vector.load %arg7[%c0_81, %c6, %c0_82, %c0_83] : memref<1x10x16x128xf32, #tpu.memory_space<vmem>>, vector<1x3x16x128xf32>
    %112 = vector.shape_cast %111 : vector<1x3x16x128xf32> to vector<3x16x128xf32>
    %113 = vector.shape_cast %110 : vector<3x16x128xf32> to vector<1x3x16x128xf32>
    tpu.vector_store %arg7[%c0_81, %c6, %c0_82, %c0_83], %113 {strides = array<i32>} : memref<1x10x16x128xf32, #tpu.memory_space<vmem>>, vector<1x3x16x128xf32>,
    %c0_84 = arith.constant 0 : index
    %c9 = arith.constant 9 : index
    %c0_85 = arith.constant 0 : index
    %c0_86 = arith.constant 0 : index
    %114 = vector.load %arg7[%c0_84, %c9, %c0_85, %c0_86] : memref<1x10x16x128xf32, #tpu.memory_space<vmem>>, vector<1x1x16x128xf32>
    %115 = vector.shape_cast %114 : vector<1x1x16x128xf32> to vector<16x128xf32>
    %116 = vector.shape_cast %98 : vector<16x128xf32> to vector<1x1x16x128xf32>
    tpu.vector_store %arg7[%c0_84, %c9, %c0_85, %c0_86], %116 {strides = array<i32>} : memref<1x10x16x128xf32, #tpu.memory_space<vmem>>, vector<1x1x16x128xf32>,
    return
  }
  func.func @transform_0(%arg0: i32, %arg1: i32) -> (i32, i32, i32, i32, i32) {
    %c0_i32 = arith.constant 0 : i32
    %c0_i32_0 = arith.constant 0 : i32
    %c0_i32_1 = arith.constant 0 : i32
    %c0_i32_2 = arith.constant 0 : i32
    return %arg0, %c0_i32, %c0_i32_0, %arg1, %c0_i32_1 : i32, i32, i32, i32, i32
  }
  func.func @transform_1(%arg0: i32, %arg1: i32) -> (i32, i32, i32, i32, i32) {
    %c1_i32 = arith.constant 1 : i32
    %c0_i32 = arith.constant 0 : i32
    %c0_i32_0 = arith.constant 0 : i32
    %c0_i32_1 = arith.constant 0 : i32
    return %arg0, %c1_i32, %c0_i32, %arg1, %c0_i32_0 : i32, i32, i32, i32, i32
  }
  func.func @transform_2(%arg0: i32, %arg1: i32) -> (i32, i32, i32, i32, i32) {
    %c2_i32 = arith.constant 2 : i32
    %c0_i32 = arith.constant 0 : i32
    %c0_i32_0 = arith.constant 0 : i32
    %c0_i32_1 = arith.constant 0 : i32
    return %arg0, %c2_i32, %c0_i32, %arg1, %c0_i32_0 : i32, i32, i32, i32, i32
  }
  func.func @transform_3(%arg0: i32, %arg1: i32) -> (i32, i32, i32, i32, i32) {
    %c2_i32 = arith.constant 2 : i32
    %0 = arith.muli %arg1, %c2_i32 : i32
    %c1_i32 = arith.constant 1 : i32
    %1 = arith.subi %0, %c1_i32 : i32
    %c0_i32 = arith.constant 0 : i32
    %2 = arith.maxsi %1, %c0_i32 : i32
    %c1_i32_0 = arith.constant 1 : i32
    %c0_i32_1 = arith.constant 0 : i32
    %c0_i32_2 = arith.constant 0 : i32
    %c0_i32_3 = arith.constant 0 : i32
    return %arg0, %c1_i32_0, %c0_i32_1, %2, %c0_i32_2 : i32, i32, i32, i32, i32
  }
  func.func @transform_4(%arg0: i32, %arg1: i32) -> (i32, i32, i32, i32, i32) {
    %c1_i32 = arith.constant 1 : i32
    %0 = arith.addi %arg1, %c1_i32 : i32
    %c2_i32 = arith.constant 2 : i32
    %1 = arith.muli %0, %c2_i32 : i32
    %c1_i32_0 = arith.constant 1 : i32
    %2 = arith.minsi %1, %c1_i32_0 : i32
    %c1_i32_1 = arith.constant 1 : i32
    %c0_i32 = arith.constant 0 : i32
    %c0_i32_2 = arith.constant 0 : i32
    %c0_i32_3 = arith.constant 0 : i32
    return %arg0, %c1_i32_1, %c0_i32, %2, %c0_i32_2 : i32, i32, i32, i32, i32
  }
  func.func @transform_5(%arg0: i32, %arg1: i32) -> (i32, i32, i32, i32) {
    %c0_i32 = arith.constant 0 : i32
    %c0_i32_0 = arith.constant 0 : i32
    %c0_i32_1 = arith.constant 0 : i32
    return %arg0, %c0_i32, %arg1, %c0_i32_0 : i32, i32, i32, i32
  }
}

</mosaic_0001>

<bundles_post_ra>
// kernel: tpu_custom_call.1
= control target key start
LH: loop header
LB: loop body
LE: loop exit
PB: predicated region body
PF: predicated region fallthrough
CT: control target
= control target key end

     0   :  { %s1606_s0 = inlined_call_operand.hbm [shape: f32[2,3,3,16,128], index: 0, kind: input, shape index: {}]   ;;  %s1607_s1 = inlined_call_operand.hbm [shape: f32[2,3,3,16,128], index: 1, kind: input, shape index: {}]   ;;  %s1608_s2 = inlined_call_operand.hbm [shape: f32[2,3,3,16,128], index: 2, kind: input, shape index: {}]   ;;  %s1609_s3 = inlined_call_operand.hbm [shape: f32[2,3,3,16,128], index: 3, kind: input, shape index: {}]   ;;  %s1610_s4 = inlined_call_operand.hbm [shape: f32[2,3,3,16,128], index: 4, kind: input, shape index: {}]   ;;  %s1611_s5 = inlined_call_operand.hbm [shape: f32[2,10,16,128], index: 5, kind: output, shape index: {}]  }
   0x1   :  { %1623 = sst [smem:[#allocation23_spill]] %s1607_s1 }
   0x2   :  { %1624 = sst [smem:[#allocation24_spill]] %s1609_s3 }
   0x3   :  { %1625 = sst [smem:[#allocation25_spill]] %s1611_s5 }
   0x4   :  { %10 = vsyncpa [#allocation3], 0 }
   0x5   :  { %12 = vsyncpa [#allocation3 + $0x1], 0 }
   0x6   :  { %13 = vsyncpa [#allocation6], 0 }
   0x7   :  { %15 = vsyncpa [#allocation6 + $0x1], 0 }
   0x8   :  { %16 = vsyncpa [#allocation9], 0 }
   0x9   :  { %18 = vsyncpa [#allocation9 + $0x1], 0 }
   0xa   :  { %19 = vsyncpa [#allocation4], 0 }
   0xb   :  { %21 = vsyncpa [#allocation4 + $0x1], 0  ;;  %s1284_s18 = smov 0   ;;  %s1286_s19 = smov 0  }
   0xc   :  { %s1288_s20 = smov 0   ;;  %s1290_s21 = smov 0  }
   0xd   :  { %s1292_s22 = smov 0   ;;  %s1294_s23 = smov 0  }
   0xe LB: > { %1626 = sst [smem:[#allocation16_spill]] %s1218_s18  ;;  %s1315_s24 = sadd.s32 4294967295, %s1238_s23   ;;  %s1238_s23 = sphi %s1294_s23, %s27_s23   ;;  %s1234_s22 = sphi %s1292_s22, %s1652_s22   ;;  %s1230_s21 = sphi %s1290_s21, %s1651_s21   ;;  %s1226_s20 = sphi %s1288_s20, %s1650_s20   ;;  %s1222_s19 = sphi %s1286_s19, %s1654_s19   ;;  %s1218_s18 = sphi %s1284_s18, %s1653_s18  }
   0xf   : > { %1627 = sst [smem:[#allocation17_spill]] %s1226_s20  ;;  %s853_s25 = sadd.s32 4294967294, %s1238_s23  }
  0x10   : > { %1628 = sst [smem:[#allocation18_spill]] %s1234_s22  ;;  %s39_s26 = sadd.s32 1, %s1234_s22 }
  0x11   : > { %1629 = sst [smem:[#allocation19_spill]] %s1238_s23  ;;  %s48_s27 = sadd.s32 1, %s1226_s20 }
  0x12   : > { %p41_p0 = scmp.ge.s32.totalorder %s39_s26, 2  ;;  %p55_p1 = scmp.ne.s32.totalorder %s1226_s20, %s1222_s19 }
  0x13   : > { %p56_p2 = scmp.eq.s32.totalorder %s1238_s23, 0  ;;  %p61_p3 = scmp.ne.s32.totalorder %s1222_s19, %s1218_s18 }
  0x14   : > { %s1656_s26 = smov (%p41_p0, %s39_s26), 0  ;;  %p62_p5 = scmp.eq.s32.totalorder %s1315_s24, 0 }
  0x15   : > { %1630 = sst [smem:[#allocation20_spill]] %s1656_s26  ;;  %p1327_p4 = por %p56_p2, %p55_p1 }
  0x16   : > { %s43_s29 = ssub.s32 %s1234_s22, %s1656_s26  ;;  %p215_p6 = scmp.eq.s32.totalorder %s1315_s24, 1 }
  0x17   : > { %p46_p7 = scmp.eq.s32.totalorder %s43_s29, 0  ;;  %p1335_p8 = por %p62_p5, %p61_p3 }
  0x18   : > { %p1339_p9 = por %p215_p6, %p55_p1  ;;  %p221_p10 = scmp.eq.s32.totalorder %s853_s25, 1 }
  0x19   : > { %s1344_s7 = scalar_select %p46_p7, %s1226_s20, %s48_s27  }
  0x1a   : > { %p1346_p11 = por %p221_p10, %p61_p3  ;;  %p855_p12 = scmp.ge.s32.totalorder %s1238_s23, 2 }
  0x1b   : > { %1634 = sst [smem:[#allocation21_spill]] %s1344_s7  ;;  %p948_p13 = scmp.lt.s32.totalorder %s1238_s23, 2 }
  0x1c   : > { %s1635_s8 = scalar_select %p1346_p11, 1, 0 }
  0x1d   : > { %s1353_s9 = sand.u32 1, %s1226_s20   ;;  %s1359_s11 = smul.u32 2304, %s1234_s22 }
  0x1e   : > { %1636 = sst [smem:[#allocation22_spill]] %s1635_s8  ;;  %s1356_s10 = smul.u32 48, %s1353_s9 }
  0x1f   : > { %p1363_p0 = pnand %p948_p13, %p1327_p4  ;;  %s1613_s13 = sand.u32 1, %s1238_s23  }
  0x20   : > { %s1638_s1 = sld [smem:[#allocation23_spill]]  ;;  %s268_s25 = scalar_lea.vmem [#allocation5], %s1356_s10 }
  0x21   : > { %s278_s27 = sshll.u32 %s268_s25, 4  ;;  %s1375_s29 = scalar_lea.sflag [#allocation6], %s1613_s13  ;;  %s279_s27 = int_to_ptr.vmem [resolvable:$true] %s278_s27 }
  0x22   : > { %p1379_p1 = pneg %p1363_p0  ;;  %s1019_s26 = scalar_lea.vmem %s279_s27, 768 }
  0x23   : > { %p1020_p2 = scmp.ne.s32.totalorder %s279_s27, %s1019_s26  ;;  %s1240_s14 = smov [#allocation5]  }
  0x24   : > { %s1024_s15 = sshll.u32 %s1240_s14, 4  ;;  %s1025_s15 = int_to_ptr.vmem [resolvable:$false] %s1024_s15 }
  0x25   : > { %p1022_p3 = pnand %p1020_p2, %p1379_p1  ;;  %p1027_p5 = scmp.lt.s32.totalorder %s279_s27, %s1025_s15 }
  0x26   : > { %s713_s16 = scalar_lea.hbm %s1638_s1, %s1359_s11 }
  0x27   : > { %s714_s17 = scalar_lea.hbm %s713_s16, 768  ;;  %p1023_p4 = pneg %p1022_p3 }
  0x28   : > { %s1026_s16 = scalar_lea.vmem %s1025_s15, 1536 }
  0x29   : > { %p1028_p6 = scmp.lt.s32.totalorder %s1026_s16, %s1019_s26 }
  0x2b   : > { %p1029_p7 = por %p1028_p6, %p1027_p5 }
  0x2d   : > { %p1030_p10 = pnand %p1029_p7, %p1023_p4 }
  0x2f   : > { %1033 = shalt.err (!%p1030_p10)
}
  0x30   : > { %s1241_s25 = smov 128   ;;  %s1242_s13 = smov 8  }
  0x31   : > { %934 = dma.hbm_to_vmem [thread:$0]  (!%p1363_p0), %s714_s17, 768, %s279_s27, %s1375_s29, %s1241_s25, %s1241_s25, %s1242_s13  }
  0x32   : > { %p861_p13 = scmp.ge.s32.totalorder %s1238_s23, 1  ;;  %p364_p2 = scmp.lt.s32.totalorder %s1238_s23, 3 }
  0x33   : > { %s1618_s26 = smul.u32 24, %s1353_s9  ;;  %s1640_s3 = sld [smem:[#allocation24_spill]] }
  0x34   : > { %p1398_p3 = pnand %p861_p13, %p364_p2  ;;  %s1642_s8 = sand.u32 1, %s1238_s23  }
  0x35   : > { %s316_s7 = scalar_lea.vmem [#allocation8], %s1618_s26  ;;  %s1406_s18 = scalar_lea.sflag [#allocation9], %s1642_s8 }
  0x36   : > { %s329_s20 = sshll.u32 %s316_s7, 4  ;;  %s1243_s27 = smov [#allocation8]   ;;  %s330_s20 = int_to_ptr.vmem [resolvable:$true] %s329_s20 }
  0x37   : > { %s1048_s17 = scalar_lea.vmem %s330_s20, 384  ;;  %s1053_s14 = sshll.u32 %s1243_s27, 4  ;;  %s1054_s14 = int_to_ptr.vmem [resolvable:$false] %s1053_s14 }
  0x38   : > { %p1049_p4 = scmp.ne.s32.totalorder %s330_s20, %s1048_s17  ;;  %s1055_s15 = scalar_lea.vmem %s1054_s14, 768 }
  0x39   : > { %s730_s16 = scalar_lea.hbm %s1640_s3, %s1359_s11  ;;  %p1056_p7 = scmp.lt.s32.totalorder %s330_s20, %s1054_s14 }
  0x3a   : > { %s731_s22 = scalar_lea.hbm %s730_s16, 768  ;;  %p1051_p5 = pnand %p1049_p4, %p1379_p1 }
  0x3b   : > { %p1057_p10 = scmp.lt.s32.totalorder %s1055_s15, %s1048_s17 }
  0x3c   : > { %p1052_p6 = pneg %p1051_p5 }
  0x3d   : > { %p1058_p13 = por %p1057_p10, %p1056_p7 }
  0x3f   : > { %p1059_p2 = pnand %p1058_p13, %p1052_p6 }
  0x41   : > { %1062 = shalt.err (!%p1059_p2)
}
  0x42   : > { %s1622_s16 = smov 256   ;;  %s253_s27 = scalar_lea.hbm %s1606_s0, %s1359_s11 }
  0x43   : > { %940 = dma.hbm_to_vmem [thread:$0]  (!%p1363_p0), %s731_s22, 384, %s330_s20, %s1406_s18, %s1622_s16, %s1241_s25, %s1242_s13  }
  0x44   : > { %s245_s17 = scalar_lea.vmem [#allocation2], %s1356_s10  ;;  %s242_s15 = scalar_lea.sflag [#allocation3], %s1353_s9 }
  0x45   : > { %s254_s14 = sshll.u32 %s245_s17, 4  ;;  %s1245_s3 = smov [#allocation2]   ;;  %s255_s14 = int_to_ptr.vmem [resolvable:$true] %s254_s14 }
  0x46   : > { %s1077_s26 = scalar_lea.vmem %s255_s14, 768  ;;  %s1082_s23 = sshll.u32 %s1245_s3, 4  ;;  %s1083_s23 = int_to_ptr.vmem [resolvable:$false] %s1082_s23 }
  0x47   : > { %p1078_p4 = scmp.ne.s32.totalorder %s255_s14, %s1077_s26  ;;  %s1084_s5 = scalar_lea.vmem %s1083_s23, 1536 }
  0x48   : > { %p1085_p7 = scmp.lt.s32.totalorder %s255_s14, %s1083_s23  ;;  %p1086_p10 = scmp.lt.s32.totalorder %s1084_s5, %s1077_s26 }
  0x49   : > { %p1080_p5 = pnand %p1078_p4, %p1379_p1 }
  0x4a   : > { %p1087_p13 = por %p1086_p10, %p1085_p7 }
  0x4b   : > { %p1081_p6 = pneg %p1080_p5 }
  0x4d   : > { %p1088_p2 = pnand %p1087_p13, %p1081_p6 }
  0x4f   : > { %1091 = shalt.err (!%p1088_p2)
}
  0x50   : > { %931 = dma.hbm_to_vmem [thread:$0]  (!%p1363_p0), %s253_s27, 768, %s255_s14, %s242_s15, %s1241_s25, %s1241_s25, %s1242_s13  }
  0x51   : > { %s722_s3 = scalar_lea.hbm %s1608_s2, %s1359_s11  ;;  %s292_s7 = scalar_lea.vmem [#allocation7], %s1356_s10 }
  0x52   : > { %s302_s8 = sshll.u32 %s292_s7, 4  ;;  %s723_s23 = scalar_lea.hbm %s722_s3, 1536  ;;  %s303_s8 = int_to_ptr.vmem [resolvable:$true] %s302_s8 }
  0x53   : > { %s1105_s5 = scalar_lea.vmem %s303_s8, 768  ;;  %s1246_s26 = smov [#allocation7]  }
  0x54   : > { %p1106_p4 = scmp.ne.s32.totalorder %s303_s8, %s1105_s5  ;;  %s1110_s17 = sshll.u32 %s1246_s26, 4  ;;  %s1111_s17 = int_to_ptr.vmem [resolvable:$false] %s1110_s17 }
  0x55   : > { %s1112_s16 = scalar_lea.vmem %s1111_s17, 1536  ;;  %p1113_p7 = scmp.lt.s32.totalorder %s303_s8, %s1111_s17 }
  0x56   : > { %p1108_p5 = pnand %p1106_p4, %p1379_p1  ;;  %p1114_p10 = scmp.lt.s32.totalorder %s1112_s16, %s1105_s5 }
  0x58   : > { %p1109_p6 = pneg %p1108_p5  ;;  %p1115_p13 = por %p1114_p10, %p1113_p7 }
  0x5a   : > { %p1116_p2 = pnand %p1115_p13, %p1109_p6 }
  0x5c   : > { %1119 = shalt.err (!%p1116_p2)
}
  0x5d   : > { %937 = dma.hbm_to_vmem [thread:$0]  (!%p1363_p0), %s723_s23, 768, %s303_s8, %s1375_s29, %s1241_s25, %s1241_s25, %s1242_s13  }
  0x5e   : > { %s904_s10 = sadd.s32 128, %s1359_s11  ;;  %s1643_s20 = smul.u32 24, %s1353_s9 }
  0x5f   : > { %s738_s15 = scalar_lea.hbm %s1610_s4, %s904_s10  ;;  %s1247_s5 = smov [#allocation10]  }
  0x60   : > { %s343_s16 = scalar_lea.vmem [#allocation10], %s1643_s20  ;;  %s739_s3 = scalar_lea.hbm %s738_s15, 768 }
  0x61   : > { %s356_s22 = sshll.u32 %s343_s16, 4  ;;  %s1139_s26 = sshll.u32 %s1247_s5, 4  ;;  %s357_s22 = int_to_ptr.vmem [resolvable:$true] %s356_s22  ;;  %s1140_s26 = int_to_ptr.vmem [resolvable:$false] %s1139_s26 }
  0x62   : > { %s1134_s7 = scalar_lea.vmem %s357_s22, 384  ;;  %s1141_s17 = scalar_lea.vmem %s1140_s26, 768 }
  0x63   : > { %p1135_p4 = scmp.ne.s32.totalorder %s357_s22, %s1134_s7  ;;  %p1142_p7 = scmp.lt.s32.totalorder %s357_s22, %s1140_s26 }
  0x64   : > { %p1143_p10 = scmp.lt.s32.totalorder %s1141_s17, %s1134_s7 }
  0x65   : > { %p1137_p5 = pnand %p1135_p4, %p1379_p1 }
  0x66   : > { %p1144_p13 = por %p1143_p10, %p1142_p7 }
  0x67   : > { %p1138_p6 = pneg %p1137_p5 }
  0x69   : > { %p1145_p2 = pnand %p1144_p13, %p1138_p6 }
  0x6b   : > { %1148 = shalt.err (!%p1145_p2)
}
  0x6c   : > { %s1644_s9 = smov 256   ;;  %368 = sbr.rel (%p1398_p3) target bundleno = 275 (0x113), region = 40 }
  0x6d   : > { %943 = dma.hbm_to_vmem [thread:$0]  (!%p1363_p0), %s739_s3, 384, %s357_s22, %s1406_s18, %s1644_s9, %s1241_s25, %s1242_s13  }
  0x6e   : > { %s1459_s11 = sand.u32 (!%p1398_p3), 1, %s1222_s19  }
  0x6f   : > { %s912_s29 = smul.u32 (!%p1398_p3), 48, %s1459_s11  ;;  %s371_s28 = scalar_lea.sflag (!%p1398_p3), [#allocation3], %s1459_s11 }
  0x71   : > { %s1463_s8 = scalar_lea.vmem [#allocation2], %s912_s29 }
  0x72   : > { %1201 = dma.done.wait (%p1335_p8), %s371_s28, 768  }
  0x73   : > { %1203 = vsyncadd (%p1335_p8), %s371_s28, 4294966528  ;;  %s379_s18 = sand.u32 1, %s1315_s24   ;;  %s383_s12 = scalar_lea.vmem [#allocation5], %s912_s29 }
  0x74   : > { %s380_s1 = scalar_lea.sflag [#allocation6], %s379_s18 }
  0x75   : > { %1205 = dma.done.wait (%p1335_p8), %s380_s1, 1536  }
  0x76   : > { %1207 = vsyncadd (%p1335_p8), %s380_s1, 4294965760  ;;  %s913_s13 = smul.u32 24, %s1459_s11  ;;  %s1475_s25 = scalar_lea.vmem [#allocation7], %s912_s29 }
  0x77   : > { %s398_s23 = scalar_lea.sflag [#allocation9], %s379_s18 }
  0x78   : > { %s1479_s10 = scalar_lea.vmem [#allocation8], %s913_s13 }
  0x79   : > { %1209 = dma.done.wait (%p1335_p8), %s398_s23, 768  }
  0x7a   : > { %1211 = vsyncadd (%p1335_p8), %s398_s23, 4294966528  ;;  %v469_v0 = vld [vmem:[%s383_s12] sm:$0xff]  ;;  %v862_v1 = vld [vmem:[%s383_s12 + $0x10] sm:$0xff]  ;;  %s914_s24 = smul.u32 160, %s1459_s11  ;;  %s1248_s30 = smov 1   ;;  %v509_v31 = vlaneseq }
  0x7b   : > { %v866_v2 = vld [vmem:[%s383_s12 + $0x20] sm:$0xff]  ;;  %v476_v3 = vadd.f32 %v862_v1, %v469_v0  ;;  %v470_v4 = vld [vmem:[%s383_s12 + $0x8] sm:$0xff]  ;;  %v863_v5 = vld [vmem:[%s383_s12 + $0x18] sm:$0xff]  ;;  %s1249_s14 = smov 127   ;;  %s410_s15 = scalar_lea.vmem [#allocation10], %s913_s13 }
  0x7c   : > { %v867_v6 = vld [vmem:[%s383_s12 + $0x28] sm:$0xff]  ;;  %v477_v7 = vadd.f32 %v863_v5, %v470_v4  ;;  %s1488_s27 = scalar_lea.vmem [#allocation11], %s914_s24  ;;  %v608_v12 = vld [vmem:[%s1463_s8] sm:$0xff]  ;;  %v610_v14 = vld [vmem:[%s1463_s8 + $0x10] sm:$0xff]  ;;  %v510_v35 = vshrl.u32 %v509_v31, 7  ;;  %v513_v60 = vand.u32 127, %v509_v31 }
  0x7d   : > { %v487_v8 = vadd.f32 %v866_v2, %v476_v3  ;;  %886 = vst [vmem:[%s1488_s27 + $0x30] sm:$0xff] %v469_v0  ;;  %887 = vst [vmem:[%s1488_s27 + $0x38] sm:$0xff] %v470_v4  ;;  %v609_v13 = vld [vmem:[%s1463_s8 + $0x8] sm:$0xff]  ;;  %v611_v15 = vld [vmem:[%s1463_s8 + $0x18] sm:$0xff]  ;;  %s915_s20 = smul.u32 2560, %s1230_s21  ;;  %s665_s16 = sshll.u32 %s1488_s27, 4  ;;  %s1557_s16 = int_to_ptr.vmem [resolvable:$true] %s665_s16 }
  0x7e   : > { %v488_v9 = vadd.f32 %v867_v6, %v477_v7  ;;  %888 = vst [vmem:[%s1488_s27 + $0x40] sm:$0xff] %v862_v1  ;;  %889 = vst [vmem:[%s1488_s27 + $0x48] sm:$0xff] %v863_v5  ;;  %v612_v16 = vld [vmem:[%s1463_s8 + $0x20] sm:$0xff]  ;;  %v613_v17 = vld [vmem:[%s1463_s8 + $0x28] sm:$0xff]  ;;  %v518_v38 = vsub.s32 0, %v510_v35  ;;  %vm522_vm0 = vcmp.lt.s32.totalorder %v510_v35, 1 }
  0x7f   : > { %v1486_v10 = vmul.f32 0.33333334, %v487_v8  ;;  %890 = vst [vmem:[%s1488_s27 + $0x50] sm:$0xff] %v866_v2  ;;  %891 = vst [vmem:[%s1488_s27 + $0x58] sm:$0xff] %v867_v6  ;;  %v633_v18 = vld [vmem:[%s1475_s25] sm:$0xff]  ;;  %v634_v19 = vld [vmem:[%s1475_s25 + $0x8] sm:$0xff] }
  0x80   : > { %v1498_v11 = vmul.f32 0.33333334, %v488_v9  ;;  %614 = vst [vmem:[%s1488_s27] sm:$0xff] %v608_v12  ;;  %615 = vst [vmem:[%s1488_s27 + $0x8] sm:$0xff] %v609_v13  ;;  %v635_v20 = vld [vmem:[%s1475_s25 + $0x10] sm:$0xff]  ;;  %v636_v21 = vld [vmem:[%s1475_s25 + $0x18] sm:$0xff]  ;;  %vm514_vm1 = vcmp.eq.s32.totalorder %v510_v35, 0 }
  0x81   : > { %541 = vrot.lane.b32.xlu0 %v1486_v10, %s1248_s30  ;;  %548 = vrot.lane.b32.xlu1 %v1486_v10, %s1249_s14  ;;  %616 = vst [vmem:[%s1488_s27 + $0x10] sm:$0xff] %v610_v14  ;;  %617 = vst [vmem:[%s1488_s27 + $0x18] sm:$0xff] %v611_v15  ;;  %v520_v40 = vrot.slane %v1486_v10, 7  ;;  %v533_v44 = vrot.slane %v1486_v10, 1  ;;  %vm535_vm2 = vcmp.lt.s32.totalorder %v510_v35, 7  ;;  %v511_v47 = vadd.s32 8, %v510_v35 }
  0x82   : > { %618 = vst [vmem:[%s1488_s27 + $0x20] sm:$0xff] %v612_v16  ;;  %619 = vst [vmem:[%s1488_s27 + $0x28] sm:$0xff] %v613_v17  ;;  %v637_v22 = vld [vmem:[%s1475_s25 + $0x20] sm:$0xff]  ;;  %v638_v23 = vld [vmem:[%s1475_s25 + $0x28] sm:$0xff]  ;;  %v521_v39 = vrot.slane %v1498_v11, 7  ;;  %v534_v43 = vrot.slane %v1498_v11, 1 }
  0x83   : > { %892 = vst [vmem:[%s1488_s27 + $0x60] sm:$0xff] %v633_v18  ;;  %893 = vst [vmem:[%s1488_s27 + $0x68] sm:$0xff] %v634_v19  ;;  %v471_v24 = vld [vmem:[%s1479_s10 + $0x7] sm:$0x1]  ;;  %v864_v25 = vld [vmem:[%s1479_s10 + $0xf] sm:$0x1] }
  0x84   : > { %894 = vst [vmem:[%s1488_s27 + $0x70] sm:$0xff] %v635_v20  ;;  %895 = vst [vmem:[%s1488_s27 + $0x78] sm:$0xff] %v636_v21  ;;  %v480_v26 = vadd.f32 %v864_v25, %v471_v24  ;;  %v868_v27 = vld [vmem:[%s1479_s10 + $0x17] sm:$0x1]  ;;  %v472_v28 = vld [vmem:[%s410_s15] sm:$0x1]  ;;  %v524_v45 = vsel %vm522_vm0, %v521_v39, %v520_v40  ;;  %v536_v49 = vsel %vm535_vm2, %v533_v44, %v534_v43 }
  0x85   : > { %543 = vrot.lane.b32.xlu0 %v1498_v11, %s1248_s30  ;;  %550 = vrot.lane.b32.xlu1 %v1498_v11, %s1249_s14  ;;  %896 = vst [vmem:[%s1488_s27 + $0x80] sm:$0xff] %v637_v22  ;;  %897 = vst [vmem:[%s1488_s27 + $0x88] sm:$0xff] %v638_v23  ;;  %vm528_vm3 = vcmp.eq.s32.totalorder %v511_v47, 15  ;;  %v537_v51 = vsel %vm535_vm2, %v534_v43, %v533_v44  ;;  %v566_v53 = vsub.f32 %v1486_v10, %v536_v49  ;;  %v1250_v7 = vmov 0.0   ;;  %s1645_s7 = sld [smem:[#allocation25_spill]]  ;;  %s650_s21 = scalar_lea.sflag [#allocation4], %s1459_s11 }
  0x86   : > { %v865_v29 = vld [vmem:[%s410_s15 + $0x8] sm:$0x1]  ;;  %v491_v30 = vadd.f32 %v868_v27, %v480_v26  ;;  %v869_v33 = vld [vmem:[%s410_s15 + $0x10] sm:$0x1]  ;;  %v523_v54 = vsel %vm522_vm0, %v520_v40, %v521_v39  ;;  %vm540_vm4 = vcmp.eq.s32.totalorder %v513_v60, 0  ;;  %vm547_vm5 = vcmp.eq.s32.totalorder %v513_v60, 127 }
  0x87   : > { %v483_v32 = vadd.f32 %v865_v29, %v472_v28  ;;  %v568_v57 = vand.u32 2147483647, %v566_v53  ;;  %v555_v58 = vsub.f32 %v1498_v11, %v523_v54  ;;  %s1150_s26 = scalar_lea.vmem %s1557_s16, 2560  ;;  %s1251_s17 = smov [#allocation11]  }
  0x88   : > { %v497_v34 = vmul.f32 0.33333334, %v491_v30  ;;  %p1151_p8 = scmp.ne.s32.totalorder %s1557_s16, %s1150_s26  ;;  %s1154_s9 = sshll.u32 %s1251_s17, 4  ;;  %s1155_s9 = int_to_ptr.vmem [resolvable:$false] %s1154_s9 }
  0x89   : > { %v494_v36 = vadd.f32 %v869_v33, %v483_v32  ;;  %v874_v62 = vadd.f32 -0.06250095, %v568_v57  ;;  %v557_v63 = vand.u32 2147483647, %v555_v58  ;;  %s1156_s29 = scalar_lea.vmem %s1155_s9, 5120  ;;  %p1157_p3 = scmp.lt.s32.totalorder %s1557_s16, %s1155_s9 }
  0x8a   : > { %v503_v37 = vmul.f32 0.0, %v497_v34  ;;  %p1152_p0 = pnand %p1151_p8, %p1339_p9  ;;  %p1158_p4 = scmp.lt.s32.totalorder %s1156_s29, %s1150_s26 }
  0x8b   : > { %v498_v41 = vmul.f32 0.33333334, %v494_v36  ;;  %vm572_vm7 = vcmp.lt.f32.partialorder %v874_v62, 0.0001  ;;  %v871_v1 = vadd.f32 -0.06250095, %v557_v63  ;;  %s1555_s5 = scalar_lea.hbm %s1645_s7, %s915_s20 }
  0x8c   : > { %v519_v42 = vrot.slane %v503_v37, %v518_v38  ;;  %v876_v9 = vsel %vm572_vm7, 1.0, %v1250_v7  ;;  %p1153_p1 = pneg %p1152_p0  ;;  %p1159_p5 = por %p1158_p4, %p1157_p3 }
  0x8d   : > { %v508_v46 = vmul.f32 0.0, %v498_v41  ;;  %vm561_vm8 = vcmp.lt.f32.partialorder %v871_v1, 0.0001 }
  0x8e   : > { %v525_v48 = vsel %vm514_vm1, %v519_v42, %v524_v45  ;;  %p1160_p6 = pnand %p1159_p5, %p1153_p1 }
  0x8f   : > { %v532_v50 = vrot.slane %v508_v46, %v518_v38  ;;  %v554_v52 = vsub.f32 %v1486_v10, %v525_v48 }
  0x91   : > { %v539_v55 = vsel %vm528_vm3, %v532_v50, %v537_v51  ;;  %v556_v56 = vand.u32 2147483647, %v554_v52 }
  0x92   : > { %v567_v59 = vsub.f32 %v1498_v11, %v539_v55 }
  0x93   : > { %v870_v61 = vadd.f32 -0.06250095, %v556_v56 }
  0x94   : > { %v569_v0 = vand.u32 2147483647, %v567_v59 }
  0x95   : > { %vm560_vm6 = vcmp.lt.f32.partialorder %v870_v61, 0.0001 }
  0x96   : > { %v875_v4 = vadd.f32 -0.06250095, %v569_v0  ;;  %v872_v8 = vsel %vm560_vm6, 1.0, %v1250_v7 }
  0x97   : > { %v578_v18 = vadd.f32 %v876_v9, %v872_v8 }
  0x98   : > { %vm573_vm9 = vcmp.lt.f32.partialorder %v875_v4, 0.0001 }
  0x99   : > { %v877_v25 = vsel %vm573_vm9, 1.0, %v1250_v7 }
  0xf3   : > { %v542_v2 = vpop.permute.xlu0 %541  ;;  %v549_v3 = vpop.permute.xlu1 %548 }
  0xf4   : > { %v545_v5 = vsel %vm540_vm4, 0.0, %v542_v2  ;;  %v552_v6 = vsel %vm547_vm5, 0.0, %v549_v3 }
  0xf5   : > { %v580_v12 = vsub.f32 %v1486_v10, %v545_v5  ;;  %v594_v13 = vsub.f32 %v1486_v10, %v552_v6  ;;  %v873_v10 = vsel %vm561_vm8, 1.0, %v1250_v7 }
  0xf6   : > { %v579_v31 = vadd.f32 %v877_v25, %v873_v10 }
  0xf7   : > { %v582_v14 = vand.u32 2147483647, %v580_v12  ;;  %v596_v15 = vand.u32 2147483647, %v594_v13  ;;  %v544_v16 = vpop.permute.xlu0 %543  ;;  %v551_v17 = vpop.permute.xlu1 %550 }
  0xf8   : > { %v546_v19 = vsel %vm540_vm4, 0.0, %v544_v16  ;;  %v553_v20 = vsel %vm547_vm5, 0.0, %v551_v17 }
  0xf9   : > { %v878_v21 = vadd.f32 -0.06250095, %v582_v14  ;;  %v882_v22 = vadd.f32 -0.06250095, %v596_v15  ;;  %v581_v23 = vsub.f32 %v1498_v11, %v546_v19  ;;  %v595_v24 = vsub.f32 %v1498_v11, %v553_v20 }
  0xfb   : > { %vm586_vm10 = vcmp.lt.f32.partialorder %v878_v21, 0.0001  ;;  %vm600_vm11 = vcmp.lt.f32.partialorder %v882_v22, 0.0001  ;;  %v583_v26 = vand.u32 2147483647, %v581_v23 }
  0xfc   : > { %v880_v27 = vsel %vm586_vm10, 1.0, %v1250_v7  ;;  %v884_v28 = vsel %vm600_vm11, 1.0, %v1250_v7  ;;  %v597_v29 = vand.u32 2147483647, %v595_v24 }
  0xfd   : > { %v592_v30 = vadd.f32 %v880_v27, %v578_v18  ;;  %v879_v32 = vadd.f32 -0.06250095, %v583_v26 }
  0xfe   : > { %v883_v33 = vadd.f32 -0.06250095, %v597_v29 }
  0xff   : > { %v606_v34 = vadd.f32 %v884_v28, %v592_v30  ;;  %vm587_vm12 = vcmp.lt.f32.partialorder %v879_v32, 0.0001 }
 0x100   : > { %v881_v11 = vsel %vm587_vm12, 1.0, %v1250_v7  ;;  %vm601_vm13 = vcmp.lt.f32.partialorder %v883_v33, 0.0001 }
 0x101   : > { %898 = vst [vmem:[%s1488_s27 + $0x90] sm:$0xff] %v606_v34  ;;  %v593_v35 = vadd.f32 %v881_v11, %v579_v31  ;;  %v885_v36 = vsel %vm601_vm13, 1.0, %v1250_v7 }
 0x103   : > { %v607_v37 = vadd.f32 %v885_v36, %v593_v35 }
 0x105   : > { %899 = vst [vmem:[%s1488_s27 + $0x98] sm:$0xff] %v607_v37 }
 0x106   : > { %1163 = shalt.err (!%p1160_p6)
}
 0x107   : > { %s1164_s28 = scalar_lea.hbm %s1555_s5, 2560  ;;  %s1168_s1 = scalar_lea.hbm %s1645_s7, 5120 }
 0x108   : > { %p1165_p7 = scmp.ne.s32.totalorder %s1555_s5, %s1164_s28  ;;  %p1169_p2 = scmp.lt.s32.totalorder %s1555_s5, %s1645_s7 }
 0x109   : > { %p1170_p8 = scmp.lt.s32.totalorder %s1168_s1, %s1164_s28 }
 0x10a   : > { %p1166_p10 = pnand %p1165_p7, %p1339_p9 }
 0x10b   : > { %p1171_p0 = por %p1170_p8, %p1169_p2 }
 0x10c   : > { %p1167_p13 = pneg %p1166_p10 }
 0x10e   : > { %p1172_p1 = pnand %p1171_p0, %p1167_p13 }
 0x110   : > { %1175 = shalt.err (!%p1172_p1)
}
 0x111   : > { %s1252_s25 = smov 128   ;;  %s1253_s23 = smov 8  }
 0x112   : > { %926 = dma.vmem_to_hbm [thread:$0]  (%p1339_p9), %s1557_s16, 2560, %s1555_s5, %s650_s21, %s1252_s25, %s1252_s25, %s1253_s23  }
 0x113 PF: > { %s1646_s10 = sld [smem:[#allocation16_spill]]  ;;  %p945_p3 = pnand %p855_p12, %p1346_p11 }
 0x114   : > { %s1648_s27 = sld [smem:[#allocation19_spill]] }
 0x115   : > { %p946_p4 = pneg %p945_p3 }
 0x119   : > { %s680_s30 = sand.u32 1, %s1646_s10  }
 0x11a   : > { %s681_s14 = scalar_lea.sflag [#allocation4], %s680_s30 }
 0x11b   : > { %1213 = dma.done.wait (%p946_p4), %s681_s14, 2560  }
 0x11c   : > { %1215 = vsyncadd (%p946_p4), %s681_s14, 4294964736  ;;  %s27_s23 = sadd.s32 1, %s1648_s27   ;;  %s1649_s15 = sld [smem:[#allocation17_spill]] }
 0x11d   : > { %p24_p5 = scmp.ge.s32.totalorder %s27_s23, 4   ;;  %s1650_s20 = sld [smem:[#allocation21_spill]] }
 0x11e   : > { %s1651_s21 = sld [smem:[#allocation18_spill]]  ;;  %s1653_s18 = smov %s1222_s19 }
 0x11f   : > { %s1652_s22 = sld [smem:[#allocation20_spill]]  ;;  %26 = sbr.rel (!%p24_p5) target bundleno = 14 (0xe), region = 142 }
 0x122   : > { %s1654_s19 = smov %s1649_s15 }
 0x124   :  { %686 = vsyncpa [#allocation3], 1 }
 0x125   :  { %688 = vsyncpa [#allocation3 + $0x1], 1 }
 0x126   :  { %689 = vsyncpa [#allocation6], 1 }
 0x127   :  { %691 = vsyncpa [#allocation6 + $0x1], 1 }
 0x128   :  { %692 = vsyncpa [#allocation9], 1 }
 0x129   :  { %694 = vsyncpa [#allocation9 + $0x1], 1 }
 0x12a   :  { %695 = vsyncpa [#allocation4], 1 }
 0x12b   :  { %697 = vsyncpa [#allocation4 + $0x1], 1 }

</bundles_post_ra>
